<compile_context>
chip_gen: v7x
topology: tpu7x:2x2x1
jax: 0.10.0
libtpu: 0.0.40
codegen_flags: <defaults>
</compile_context>

<pallas_src>
import math
import functools

import jax
import jax.numpy as jnp
from jax.experimental import pallas as pl
from jax.experimental.pallas import tpu as pltpu


def _mha_kernel(q_ref, k_ref, v_ref,
                wq_ref, bq_ref, wk_ref, bk_ref, wv_ref, bv_ref,
                wo_ref, bo_ref, gamma_ref, beta_ref,
                out_ref, attn_ref,
                ctx_scr,
                *, block_b: int, seq: int, n_heads: int, d_k: int, eps: float):
    M = block_b * seq

    x_q = q_ref[...]                      # (M, D) f32 — also the residual
    x_k = k_ref[...]
    x_v = v_ref[...]

    # Linear projections; weights are pre-transposed on the host, so this is a
    # plain x @ W_t + b with M = block_b * S rows feeding the MXU.
    q_s = jnp.dot(x_q, wq_ref[...], preferred_element_type=jnp.float32) + bq_ref[...]
    k_s = jnp.dot(x_k, wk_ref[...], preferred_element_type=jnp.float32) + bk_ref[...]
    v_s = jnp.dot(x_v, wv_ref[...], preferred_element_type=jnp.float32) + bv_ref[...]

    inv_sqrt_dk = 1.0 / math.sqrt(d_k)

    # Per-head scaled dot-product attention (static loop over heads; each head
    # is a single batched einsum over the block_b batch elements).
    probs = []
    for h in range(n_heads):
        lo = h * d_k
        qh = q_s[:, lo:lo + d_k].reshape(block_b, seq, d_k)
        kh = k_s[:, lo:lo + d_k].reshape(block_b, seq, d_k)
        vh = v_s[:, lo:lo + d_k].reshape(block_b, seq, d_k)

        s = jnp.einsum('bqd,bkd->bqk', qh, kh,
                       preferred_element_type=jnp.float32) * inv_sqrt_dk
        m = jnp.max(s, axis=-1, keepdims=True)
        e = jnp.exp(s - m)
        denom = jnp.sum(e, axis=-1, keepdims=True)
        p = e / denom                                   # softmax over keys
        probs.append(p)                                 # (block_b, S, S)

        ctx_h = jnp.einsum('bqk,bkd->bqd', p, vh,
                           preferred_element_type=jnp.float32)
        # Assemble heads into the (M, D) context slab at static lane offsets.
        ctx_scr[:, lo:lo + d_k] = ctx_h.reshape(M, d_k)

    # One store per grid step for the attention probabilities.
    attn_ref[...] = jnp.stack(probs, axis=1)            # (block_b, H, S, S)

    # Output projection + residual + LayerNorm.
    output = jnp.dot(ctx_scr[...], wo_ref[...],
                     preferred_element_type=jnp.float32) + bo_ref[...]
    x = output + x_q

    mean = jnp.mean(x, axis=-1, keepdims=True)
    var = jnp.mean((x - mean) * (x - mean), axis=-1, keepdims=True)
    x_hat = (x - mean) * jax.lax.rsqrt(var + eps)
    out_ref[...] = x_hat * gamma_ref[...] + beta_ref[...]


def _choose_block_batch(B: int, S: int, n_heads: int, D: int) -> int:
    """Largest divisor of B whose block fits comfortably in VMEM and keeps
    the projection M-dim <= 1024 (targets ~128 rows for MXU fill)."""
    best = 1
    budget = 20 << 20            # bytes, conservative even for v7x's smaller VMEM
    for bb in range(1, B + 1):
        if B % bb:
            continue
        rows = bb * S
        # rough f32 bytes: double-buffered Q/K/V + out blocks, attn block, ctx scratch
        vmem = 4 * (2 * (4 * rows * D + bb * n_heads * S * S) + rows * D)
        if rows <= 1024 and vmem <= budget:
            best = bb
    return best


def multihead_attention(Q, K, V, params, *, n_heads: int, eps: float = 1e-5,
                        block_b: int | None = None):
    """Q, K, V: (B, S, D) float32. Returns (out (B,S,D), attn (B,H,S,S))."""
    B, S, D = Q.shape
    d_k = D // n_heads
    (wq, bq, wk, bk, wv, bv, wo, bo, gamma, beta) = params

    if block_b is None:
        block_b = _choose_block_batch(B, S, n_heads, D)
    assert B % block_b == 0, "block_b must divide B"
    grid_b = B // block_b
    M = block_b * S

    # Pre-transpose the nn.Linear weights once on the host (y = x @ W.T + b).
    wq_t, wk_t, wv_t, wo_t = wq.T, wk.T, wv.T, wo.T
    bq2, bk2, bv2, bo2 = (b.reshape(1, D) for b in (bq, bk, bv, bo))
    gamma2, beta2 = gamma.reshape(1, D), beta.reshape(1, D)

    # Flatten (B, S, D) -> (B*S, D) so each grid step sees a tall (M, D) slab.
    q2, k2, v2 = (x.reshape(B * S, D) for x in (Q, K, V))

    seq_spec = pl.BlockSpec((M, D), lambda i: (i, 0))
    mat_spec = pl.BlockSpec((D, D), lambda i: (0, 0))
    vec_spec = pl.BlockSpec((1, D), lambda i: (0, 0))

    kernel = functools.partial(_mha_kernel, block_b=block_b, seq=S,
                               n_heads=n_heads, d_k=d_k, eps=eps)

    out2, attn = pl.pallas_call(
        kernel,
        out_shape=(
            jax.ShapeDtypeStruct((B * S, D), jnp.float32),
            jax.ShapeDtypeStruct((B, n_heads, S, S), jnp.float32),
        ),
        grid_spec=pltpu.PrefetchScalarGridSpec(
            num_scalar_prefetch=0,
            grid=(grid_b,),
            in_specs=[
                seq_spec, seq_spec, seq_spec,          # Q, K, V (flattened)
                mat_spec, vec_spec,                    # W_Q^T, b_Q
                mat_spec, vec_spec,                    # W_K^T, b_K
                mat_spec, vec_spec,                    # W_V^T, b_V
                mat_spec, vec_spec,                    # li1 W^T, b
                vec_spec, vec_spec,                    # layer_norm gamma, beta
            ],
            out_specs=[
                pl.BlockSpec((M, D), lambda i: (i, 0)),
                pl.BlockSpec((block_b, n_heads, S, S), lambda i: (i, 0, 0, 0)),
            ],
            scratch_shapes=[pltpu.VMEM((M, D), jnp.float32)],   # context slab
        ),
        compiler_params=pltpu.CompilerParams(
            dimension_semantics=("parallel",)),
    )(q2, k2, v2, wq_t, bq2, wk_t, bk2, wv_t, bv2, wo_t, bo2, gamma2, beta2)

    return out2.reshape(B, S, D), attn


def init_params(key, d_model):
    """Deterministic nn.Linear-style init (uniform +-1/sqrt(fan_in))."""
    ks = jax.random.split(key, 8)
    bound = 1.0 / math.sqrt(d_model)

    def lin(kw, kb):
        w = jax.random.uniform(kw, (d_model, d_model), jnp.float32, -bound, bound)
        b = jax.random.uniform(kb, (d_model,), jnp.float32, -bound, bound)
        return w, b

    wq, bq = lin(ks[0], ks[1])
    wk, bk = lin(ks[2], ks[3])
    wv, bv = lin(ks[4], ks[5])
    wo, bo = lin(ks[6], ks[7])
    gamma = jnp.ones((d_model,), jnp.float32)
    beta = jnp.zeros((d_model,), jnp.float32)
    return (wq, bq, wk, bk, wv, bv, wo, bo, gamma, beta)


def _reference(Q, K, V, params, n_heads, eps=1e-5):
    """Pure-JAX reference mirroring the PyTorch forward."""
    (wq, bq, wk, bk, wv, bv, wo, bo, gamma, beta) = params
    B, S, D = Q.shape
    d_k = D // n_heads

    def proj(x, w, b):
        return (x @ w.T + b).reshape(B, S, n_heads, d_k).transpose(0, 2, 1, 3)

    q_s, k_s, v_s = proj(Q, wq, bq), proj(K, wk, bk), proj(V, wv, bv)
    scores = jnp.einsum('bhqd,bhkd->bhqk', q_s, k_s) / math.sqrt(d_k)
    attn = jax.nn.softmax(scores, axis=-1)
    ctx = jnp.einsum('bhqk,bhkd->bhqd', attn, v_s)
    ctx = ctx.transpose(0, 2, 1, 3).reshape(B, S, D)
    out = ctx @ wo.T + bo + Q
    mean = out.mean(-1, keepdims=True)
    var = ((out - mean) ** 2).mean(-1, keepdims=True)
    out = (out - mean) / jnp.sqrt(var + eps) * gamma + beta
    return out, attn


if __name__ == "__main__":
    # args.d_model = 32, args.n_heads = 4  -> d_k = d_v = 8
    B, S, D, H = 2, 8, 32, 4

    key = jax.random.PRNGKey(0)
    kq, kk, kv, kp = jax.random.split(key, 4)
    Q = jax.random.normal(kq, (B, S, D), jnp.float32)
    K = jax.random.normal(kk, (B, S, D), jnp.float32)
    V = jax.random.normal(kv, (B, S, D), jnp.float32)
    params = init_params(kp, D)

    out, attn = multihead_attention(Q, K, V, params, n_heads=H)
    jax.block_until_ready((out, attn))

    ref_out, ref_attn = _reference(Q, K, V, params, H)
    assert out.shape == (B, S, D) and attn.shape == (B, H, S, S)
    assert jnp.allclose(out, ref_out, atol=1e-4, rtol=1e-4), "output mismatch"
    assert jnp.allclose(attn, ref_attn, atol=1e-5, rtol=1e-4), "attn mismatch"

    print("KERNEL_OK")
</pallas_src>

<mosaic_0001>
module attributes {stable_mosaic.version = 11 : i64} {
  func.func @_mha_kernel(%arg0: i32, %arg1: memref<16x32xf32, #tpu.memory_space<vmem>>, %arg2: memref<16x32xf32, #tpu.memory_space<vmem>>, %arg3: memref<16x32xf32, #tpu.memory_space<vmem>>, %arg4: memref<32x32xf32, #tpu.memory_space<vmem>>, %arg5: memref<1x32xf32, #tpu.memory_space<vmem>>, %arg6: memref<32x32xf32, #tpu.memory_space<vmem>>, %arg7: memref<1x32xf32, #tpu.memory_space<vmem>>, %arg8: memref<32x32xf32, #tpu.memory_space<vmem>>, %arg9: memref<1x32xf32, #tpu.memory_space<vmem>>, %arg10: memref<32x32xf32, #tpu.memory_space<vmem>>, %arg11: memref<1x32xf32, #tpu.memory_space<vmem>>, %arg12: memref<1x32xf32, #tpu.memory_space<vmem>>, %arg13: memref<1x32xf32, #tpu.memory_space<vmem>>, %arg14: memref<16x32xf32, #tpu.memory_space<vmem>>, %arg15: memref<2x4x8x8xf32, #tpu.memory_space<vmem>>, %arg16: memref<16x32xf32, #tpu.memory_space<vmem>>) attributes {dimension_semantics = [#tpu.dimension_semantics<parallel>], iteration_bounds = array<i64: 1>, scalar_prefetch = 0 : i64, scratch_operands = 1 : i64, tpu.core_type = #tpu.core_type<tc>, window_params = [{transform_indices = @transform_0, window_bounds = array<i64: 16, 32>}, {transform_indices = @transform_1, window_bounds = array<i64: 16, 32>}, {transform_indices = @transform_2, window_bounds = array<i64: 16, 32>}, {pipeline_mode = #tpu.pipeline_mode<synchronous>, transform_indices = @transform_3, window_bounds = array<i64: 32, 32>}, {pipeline_mode = #tpu.pipeline_mode<synchronous>, transform_indices = @transform_4, window_bounds = array<i64: 1, 32>}, {pipeline_mode = #tpu.pipeline_mode<synchronous>, transform_indices = @transform_5, window_bounds = array<i64: 32, 32>}, {pipeline_mode = #tpu.pipeline_mode<synchronous>, transform_indices = @transform_6, window_bounds = array<i64: 1, 32>}, {pipeline_mode = #tpu.pipeline_mode<synchronous>, transform_indices = @transform_7, window_bounds = array<i64: 32, 32>}, {pipeline_mode = #tpu.pipeline_mode<synchronous>, transform_indices = @transform_8, window_bounds = array<i64: 1, 32>}, {pipeline_mode = #tpu.pipeline_mode<synchronous>, transform_indices = @transform_9, window_bounds = array<i64: 32, 32>}, {pipeline_mode = #tpu.pipeline_mode<synchronous>, transform_indices = @transform_10, window_bounds = array<i64: 1, 32>}, {pipeline_mode = #tpu.pipeline_mode<synchronous>, transform_indices = @transform_11, window_bounds = array<i64: 1, 32>}, {pipeline_mode = #tpu.pipeline_mode<synchronous>, transform_indices = @transform_12, window_bounds = array<i64: 1, 32>}, {transform_indices = @transform_13, window_bounds = array<i64: 16, 32>}, {transform_indices = @transform_14, window_bounds = array<i64: 2, 4, 8, 8>}]} {
    %c0 = arith.constant 0 : index
    %c0_0 = arith.constant 0 : index
    %0 = vector.load %arg1[%c0, %c0_0] : memref<16x32xf32, #tpu.memory_space<vmem>>, vector<16x32xf32>
    %c0_1 = arith.constant 0 : index
    %c0_2 = arith.constant 0 : index
    %1 = vector.load %arg2[%c0_1, %c0_2] : memref<16x32xf32, #tpu.memory_space<vmem>>, vector<16x32xf32>
    %c0_3 = arith.constant 0 : index
    %c0_4 = arith.constant 0 : index
    %2 = vector.load %arg3[%c0_3, %c0_4] : memref<16x32xf32, #tpu.memory_space<vmem>>, vector<16x32xf32>
    %c0_5 = arith.constant 0 : index
    %c0_6 = arith.constant 0 : index
    %3 = vector.load %arg4[%c0_5, %c0_6] : memref<32x32xf32, #tpu.memory_space<vmem>>, vector<32x32xf32>
    %cst = arith.constant dense<0.000000e+00> : vector<16x32xf32>
    %4 = tpu.matmul %0, %3, %cst {dimension_numbers = #tpu.dot_dimension_numbers<[1], [0], [0], [1], [0, 0, 1, 1], [], []>} : vector<16x32xf32>, vector<32x32xf32>, vector<16x32xf32> -> vector<16x32xf32>
    %c0_7 = arith.constant 0 : index
    %c0_8 = arith.constant 0 : index
    %5 = vector.load %arg5[%c0_7, %c0_8] : memref<1x32xf32, #tpu.memory_space<vmem>>, vector<1x32xf32>
    %6 = vector.broadcast %5 : vector<1x32xf32> to vector<16x32xf32>
    %7 = arith.addf %4, %6 : vector<16x32xf32>
    %c0_9 = arith.constant 0 : index
    %c0_10 = arith.constant 0 : index
    %8 = vector.load %arg6[%c0_9, %c0_10] : memref<32x32xf32, #tpu.memory_space<vmem>>, vector<32x32xf32>
    %cst_11 = arith.constant dense<0.000000e+00> : vector<16x32xf32>
    %9 = tpu.matmul %1, %8, %cst_11 {dimension_numbers = #tpu.dot_dimension_numbers<[1], [0], [0], [1], [0, 0, 1, 1], [], []>} : vector<16x32xf32>, vector<32x32xf32>, vector<16x32xf32> -> vector<16x32xf32>
    %c0_12 = arith.constant 0 : index
    %c0_13 = arith.constant 0 : index
    %10 = vector.load %arg7[%c0_12, %c0_13] : memref<1x32xf32, #tpu.memory_space<vmem>>, vector<1x32xf32>
    %11 = vector.broadcast %10 : vector<1x32xf32> to vector<16x32xf32>
    %12 = arith.addf %9, %11 : vector<16x32xf32>
    %c0_14 = arith.constant 0 : index
    %c0_15 = arith.constant 0 : index
    %13 = vector.load %arg8[%c0_14, %c0_15] : memref<32x32xf32, #tpu.memory_space<vmem>>, vector<32x32xf32>
    %cst_16 = arith.constant dense<0.000000e+00> : vector<16x32xf32>
    %14 = tpu.matmul %2, %13, %cst_16 {dimension_numbers = #tpu.dot_dimension_numbers<[1], [0], [0], [1], [0, 0, 1, 1], [], []>} : vector<16x32xf32>, vector<32x32xf32>, vector<16x32xf32> -> vector<16x32xf32>
    %c0_17 = arith.constant 0 : index
    %c0_18 = arith.constant 0 : index
    %15 = vector.load %arg9[%c0_17, %c0_18] : memref<1x32xf32, #tpu.memory_space<vmem>>, vector<1x32xf32>
    %16 = vector.broadcast %15 : vector<1x32xf32> to vector<16x32xf32>
    %17 = arith.addf %14, %16 : vector<16x32xf32>
    %18 = vector.extract_strided_slice %7 {offsets = [0, 0], sizes = [16, 8], strides = [1, 1]} : vector<16x32xf32> to vector<16x8xf32>
    %19 = vector.shape_cast %18 : vector<16x8xf32> to vector<2x8x8xf32>
    %20 = vector.extract_strided_slice %12 {offsets = [0, 0], sizes = [16, 8], strides = [1, 1]} : vector<16x32xf32> to vector<16x8xf32>
    %21 = vector.shape_cast %20 : vector<16x8xf32> to vector<2x8x8xf32>
    %22 = vector.extract_strided_slice %17 {offsets = [0, 0], sizes = [16, 8], strides = [1, 1]} : vector<16x32xf32> to vector<16x8xf32>
    %23 = vector.shape_cast %22 : vector<16x8xf32> to vector<2x8x8xf32>
    "tpu.trace_start"() <{level = 10 : i32, message = "bqd,bkd->bqk"}> : () -> ()
    %cst_19 = arith.constant dense<0.000000e+00> : vector<2x8x8xf32>
    %24 = tpu.matmul %19, %21, %cst_19 {dimension_numbers = #tpu.dot_dimension_numbers<[2], [2], [1], [1], [0, 0, 0, 1, 1, 1], [0], [0]>} : vector<2x8x8xf32>, vector<2x8x8xf32>, vector<2x8x8xf32> -> vector<2x8x8xf32>
    "tpu.trace_stop"() : () -> ()
    %cst_20 = arith.constant 0.353553385 : f32
    %25 = vector.broadcast %cst_20 : f32 to vector<2x8x8xf32>
    %26 = arith.mulf %24, %25 : vector<2x8x8xf32>
    %cst_21 = arith.constant dense<0xFF800000> : vector<2x8xf32>
    %27 = vector.multi_reduction <maximumf>, %26, %cst_21 [2] : vector<2x8x8xf32> to vector<2x8xf32>
    %28 = vector.shape_cast %27 : vector<2x8xf32> to vector<2x8x1xf32>
    %29 = vector.broadcast %28 : vector<2x8x1xf32> to vector<2x8x8xf32>
    %30 = arith.subf %26, %29 : vector<2x8x8xf32>
    %31 = math.exp %30 : vector<2x8x8xf32>
    %cst_22 = arith.constant dense<0.000000e+00> : vector<2x8xf32>
    %32 = vector.multi_reduction <add>, %31, %cst_22 [2] : vector<2x8x8xf32> to vector<2x8xf32>
    %33 = vector.shape_cast %32 : vector<2x8xf32> to vector<2x8x1xf32>
    %34 = vector.broadcast %33 : vector<2x8x1xf32> to vector<2x8x8xf32>
    %35 = arith.divf %31, %34 : vector<2x8x8xf32>
    "tpu.trace_start"() <{level = 10 : i32, message = "bqk,bkd->bqd"}> : () -> ()
    %cst_23 = arith.constant dense<0.000000e+00> : vector<2x8x8xf32>
    %36 = tpu.matmul %35, %23, %cst_23 {dimension_numbers = #tpu.dot_dimension_numbers<[2], [1], [1], [2], [0, 0, 0, 1, 1, 2], [0], [0]>} : vector<2x8x8xf32>, vector<2x8x8xf32>, vector<2x8x8xf32> -> vector<2x8x8xf32>
    "tpu.trace_stop"() : () -> ()
    %37 = vector.shape_cast %36 : vector<2x8x8xf32> to vector<16x8xf32>
    %c0_24 = arith.constant 0 : index
    %c0_25 = arith.constant 0 : index
    %38 = vector.load %arg16[%c0_24, %c0_25] : memref<16x32xf32, #tpu.memory_space<vmem>>, vector<16x8xf32>
    tpu.vector_store %arg16[%c0_24, %c0_25], %37 {strides = array<i32>} : memref<16x32xf32, #tpu.memory_space<vmem>>, vector<16x8xf32>,
    %39 = vector.extract_strided_slice %7 {offsets = [0, 8], sizes = [16, 8], strides = [1, 1]} : vector<16x32xf32> to vector<16x8xf32>
    %40 = vector.shape_cast %39 : vector<16x8xf32> to vector<2x8x8xf32>
    %41 = vector.extract_strided_slice %12 {offsets = [0, 8], sizes = [16, 8], strides = [1, 1]} : vector<16x32xf32> to vector<16x8xf32>
    %42 = vector.shape_cast %41 : vector<16x8xf32> to vector<2x8x8xf32>
    %43 = vector.extract_strided_slice %17 {offsets = [0, 8], sizes = [16, 8], strides = [1, 1]} : vector<16x32xf32> to vector<16x8xf32>
    %44 = vector.shape_cast %43 : vector<16x8xf32> to vector<2x8x8xf32>
    "tpu.trace_start"() <{level = 10 : i32, message = "bqd,bkd->bqk"}> : () -> ()
    %cst_26 = arith.constant dense<0.000000e+00> : vector<2x8x8xf32>
    %45 = tpu.matmul %40, %42, %cst_26 {dimension_numbers = #tpu.dot_dimension_numbers<[2], [2], [1], [1], [0, 0, 0, 1, 1, 1], [0], [0]>} : vector<2x8x8xf32>, vector<2x8x8xf32>, vector<2x8x8xf32> -> vector<2x8x8xf32>
    "tpu.trace_stop"() : () -> ()
    %cst_27 = arith.constant 0.353553385 : f32
    %46 = vector.broadcast %cst_27 : f32 to vector<2x8x8xf32>
    %47 = arith.mulf %45, %46 : vector<2x8x8xf32>
    %cst_28 = arith.constant dense<0xFF800000> : vector<2x8xf32>
    %48 = vector.multi_reduction <maximumf>, %47, %cst_28 [2] : vector<2x8x8xf32> to vector<2x8xf32>
    %49 = vector.shape_cast %48 : vector<2x8xf32> to vector<2x8x1xf32>
    %50 = vector.broadcast %49 : vector<2x8x1xf32> to vector<2x8x8xf32>
    %51 = arith.subf %47, %50 : vector<2x8x8xf32>
    %52 = math.exp %51 : vector<2x8x8xf32>
    %cst_29 = arith.constant dense<0.000000e+00> : vector<2x8xf32>
    %53 = vector.multi_reduction <add>, %52, %cst_29 [2] : vector<2x8x8xf32> to vector<2x8xf32>
    %54 = vector.shape_cast %53 : vector<2x8xf32> to vector<2x8x1xf32>
    %55 = vector.broadcast %54 : vector<2x8x1xf32> to vector<2x8x8xf32>
    %56 = arith.divf %52, %55 : vector<2x8x8xf32>
    "tpu.trace_start"() <{level = 10 : i32, message = "bqk,bkd->bqd"}> : () -> ()
    %cst_30 = arith.constant dense<0.000000e+00> : vector<2x8x8xf32>
    %57 = tpu.matmul %56, %44, %cst_30 {dimension_numbers = #tpu.dot_dimension_numbers<[2], [1], [1], [2], [0, 0, 0, 1, 1, 2], [0], [0]>} : vector<2x8x8xf32>, vector<2x8x8xf32>, vector<2x8x8xf32> -> vector<2x8x8xf32>
    "tpu.trace_stop"() : () -> ()
    %58 = vector.shape_cast %57 : vector<2x8x8xf32> to vector<16x8xf32>
    %c0_31 = arith.constant 0 : index
    %c8 = arith.constant 8 : index
    %59 = vector.load %arg16[%c0_31, %c8] : memref<16x32xf32, #tpu.memory_space<vmem>>, vector<16x8xf32>
    tpu.vector_store %arg16[%c0_31, %c8], %58 {strides = array<i32>} : memref<16x32xf32, #tpu.memory_space<vmem>>, vector<16x8xf32>,
    %60 = vector.extract_strided_slice %7 {offsets = [0, 16], sizes = [16, 8], strides = [1, 1]} : vector<16x32xf32> to vector<16x8xf32>
    %61 = vector.shape_cast %60 : vector<16x8xf32> to vector<2x8x8xf32>
    %62 = vector.extract_strided_slice %12 {offsets = [0, 16], sizes = [16, 8], strides = [1, 1]} : vector<16x32xf32> to vector<16x8xf32>
    %63 = vector.shape_cast %62 : vector<16x8xf32> to vector<2x8x8xf32>
    %64 = vector.extract_strided_slice %17 {offsets = [0, 16], sizes = [16, 8], strides = [1, 1]} : vector<16x32xf32> to vector<16x8xf32>
    %65 = vector.shape_cast %64 : vector<16x8xf32> to vector<2x8x8xf32>
    "tpu.trace_start"() <{level = 10 : i32, message = "bqd,bkd->bqk"}> : () -> ()
    %cst_32 = arith.constant dense<0.000000e+00> : vector<2x8x8xf32>
    %66 = tpu.matmul %61, %63, %cst_32 {dimension_numbers = #tpu.dot_dimension_numbers<[2], [2], [1], [1], [0, 0, 0, 1, 1, 1], [0], [0]>} : vector<2x8x8xf32>, vector<2x8x8xf32>, vector<2x8x8xf32> -> vector<2x8x8xf32>
    "tpu.trace_stop"() : () -> ()
    %cst_33 = arith.constant 0.353553385 : f32
    %67 = vector.broadcast %cst_33 : f32 to vector<2x8x8xf32>
    %68 = arith.mulf %66, %67 : vector<2x8x8xf32>
    %cst_34 = arith.constant dense<0xFF800000> : vector<2x8xf32>
    %69 = vector.multi_reduction <maximumf>, %68, %cst_34 [2] : vector<2x8x8xf32> to vector<2x8xf32>
    %70 = vector.shape_cast %69 : vector<2x8xf32> to vector<2x8x1xf32>
    %71 = vector.broadcast %70 : vector<2x8x1xf32> to vector<2x8x8xf32>
    %72 = arith.subf %68, %71 : vector<2x8x8xf32>
    %73 = math.exp %72 : vector<2x8x8xf32>
    %cst_35 = arith.constant dense<0.000000e+00> : vector<2x8xf32>
    %74 = vector.multi_reduction <add>, %73, %cst_35 [2] : vector<2x8x8xf32> to vector<2x8xf32>
    %75 = vector.shape_cast %74 : vector<2x8xf32> to vector<2x8x1xf32>
    %76 = vector.broadcast %75 : vector<2x8x1xf32> to vector<2x8x8xf32>
    %77 = arith.divf %73, %76 : vector<2x8x8xf32>
    "tpu.trace_start"() <{level = 10 : i32, message = "bqk,bkd->bqd"}> : () -> ()
    %cst_36 = arith.constant dense<0.000000e+00> : vector<2x8x8xf32>
    %78 = tpu.matmul %77, %65, %cst_36 {dimension_numbers = #tpu.dot_dimension_numbers<[2], [1], [1], [2], [0, 0, 0, 1, 1, 2], [0], [0]>} : vector<2x8x8xf32>, vector<2x8x8xf32>, vector<2x8x8xf32> -> vector<2x8x8xf32>
    "tpu.trace_stop"() : () -> ()
    %79 = vector.shape_cast %78 : vector<2x8x8xf32> to vector<16x8xf32>
    %c0_37 = arith.constant 0 : index
    %c16 = arith.constant 16 : index
    %80 = vector.load %arg16[%c0_37, %c16] : memref<16x32xf32, #tpu.memory_space<vmem>>, vector<16x8xf32>
    tpu.vector_store %arg16[%c0_37, %c16], %79 {strides = array<i32>} : memref<16x32xf32, #tpu.memory_space<vmem>>, vector<16x8xf32>,
    %81 = vector.extract_strided_slice %7 {offsets = [0, 24], sizes = [16, 8], strides = [1, 1]} : vector<16x32xf32> to vector<16x8xf32>
    %82 = vector.shape_cast %81 : vector<16x8xf32> to vector<2x8x8xf32>
    %83 = vector.extract_strided_slice %12 {offsets = [0, 24], sizes = [16, 8], strides = [1, 1]} : vector<16x32xf32> to vector<16x8xf32>
    %84 = vector.shape_cast %83 : vector<16x8xf32> to vector<2x8x8xf32>
    %85 = vector.extract_strided_slice %17 {offsets = [0, 24], sizes = [16, 8], strides = [1, 1]} : vector<16x32xf32> to vector<16x8xf32>
    %86 = vector.shape_cast %85 : vector<16x8xf32> to vector<2x8x8xf32>
    "tpu.trace_start"() <{level = 10 : i32, message = "bqd,bkd->bqk"}> : () -> ()
    %cst_38 = arith.constant dense<0.000000e+00> : vector<2x8x8xf32>
    %87 = tpu.matmul %82, %84, %cst_38 {dimension_numbers = #tpu.dot_dimension_numbers<[2], [2], [1], [1], [0, 0, 0, 1, 1, 1], [0], [0]>} : vector<2x8x8xf32>, vector<2x8x8xf32>, vector<2x8x8xf32> -> vector<2x8x8xf32>
    "tpu.trace_stop"() : () -> ()
    %cst_39 = arith.constant 0.353553385 : f32
    %88 = vector.broadcast %cst_39 : f32 to vector<2x8x8xf32>
    %89 = arith.mulf %87, %88 : vector<2x8x8xf32>
    %cst_40 = arith.constant dense<0xFF800000> : vector<2x8xf32>
    %90 = vector.multi_reduction <maximumf>, %89, %cst_40 [2] : vector<2x8x8xf32> to vector<2x8xf32>
    %91 = vector.shape_cast %90 : vector<2x8xf32> to vector<2x8x1xf32>
    %92 = vector.broadcast %91 : vector<2x8x1xf32> to vector<2x8x8xf32>
    %93 = arith.subf %89, %92 : vector<2x8x8xf32>
    %94 = math.exp %93 : vector<2x8x8xf32>
    %cst_41 = arith.constant dense<0.000000e+00> : vector<2x8xf32>
    %95 = vector.multi_reduction <add>, %94, %cst_41 [2] : vector<2x8x8xf32> to vector<2x8xf32>
    %96 = vector.shape_cast %95 : vector<2x8xf32> to vector<2x8x1xf32>
    %97 = vector.broadcast %96 : vector<2x8x1xf32> to vector<2x8x8xf32>
    %98 = arith.divf %94, %97 : vector<2x8x8xf32>
    "tpu.trace_start"() <{level = 10 : i32, message = "bqk,bkd->bqd"}> : () -> ()
    %cst_42 = arith.constant dense<0.000000e+00> : vector<2x8x8xf32>
    %99 = tpu.matmul %98, %86, %cst_42 {dimension_numbers = #tpu.dot_dimension_numbers<[2], [1], [1], [2], [0, 0, 0, 1, 1, 2], [0], [0]>} : vector<2x8x8xf32>, vector<2x8x8xf32>, vector<2x8x8xf32> -> vector<2x8x8xf32>
    "tpu.trace_stop"() : () -> ()
    %100 = vector.shape_cast %99 : vector<2x8x8xf32> to vector<16x8xf32>
    %c0_43 = arith.constant 0 : index
    %c24 = arith.constant 24 : index
    %101 = vector.load %arg16[%c0_43, %c24] : memref<16x32xf32, #tpu.memory_space<vmem>>, vector<16x8xf32>
    tpu.vector_store %arg16[%c0_43, %c24], %100 {strides = array<i32>} : memref<16x32xf32, #tpu.memory_space<vmem>>, vector<16x8xf32>,
    %102 = vector.shape_cast %35 : vector<2x8x8xf32> to vector<2x1x8x8xf32>
    %103 = vector.shape_cast %56 : vector<2x8x8xf32> to vector<2x1x8x8xf32>
    %104 = vector.shape_cast %77 : vector<2x8x8xf32> to vector<2x1x8x8xf32>
    %105 = vector.shape_cast %98 : vector<2x8x8xf32> to vector<2x1x8x8xf32>
    %106 = tpu.concatenate %102, %103, %104, %105 in 1 : vector<2x1x8x8xf32>, vector<2x1x8x8xf32>, vector<2x1x8x8xf32>, vector<2x1x8x8xf32> -> vector<2x4x8x8xf32>
    %c0_44 = arith.constant 0 : index
    %c0_45 = arith.constant 0 : index
    %c0_46 = arith.constant 0 : index
    %c0_47 = arith.constant 0 : index
    %107 = vector.load %arg15[%c0_44, %c0_45, %c0_46, %c0_47] : memref<2x4x8x8xf32, #tpu.memory_space<vmem>>, vector<2x4x8x8xf32>
    tpu.vector_store %arg15[%c0_44, %c0_45, %c0_46, %c0_47], %106 {strides = array<i32>} : memref<2x4x8x8xf32, #tpu.memory_space<vmem>>, vector<2x4x8x8xf32>,
    %c0_48 = arith.constant 0 : index
    %c0_49 = arith.constant 0 : index
    %108 = vector.load %arg16[%c0_48, %c0_49] : memref<16x32xf32, #tpu.memory_space<vmem>>, vector<16x32xf32>
    %c0_50 = arith.constant 0 : index
    %c0_51 = arith.constant 0 : index
    %109 = vector.load %arg10[%c0_50, %c0_51] : memref<32x32xf32, #tpu.memory_space<vmem>>, vector<32x32xf32>
    %cst_52 = arith.constant dense<0.000000e+00> : vector<16x32xf32>
    %110 = tpu.matmul %108, %109, %cst_52 {dimension_numbers = #tpu.dot_dimension_numbers<[1], [0], [0], [1], [0, 0, 1, 1], [], []>} : vector<16x32xf32>, vector<32x32xf32>, vector<16x32xf32> -> vector<16x32xf32>
    %c0_53 = arith.constant 0 : index
    %c0_54 = arith.constant 0 : index
    %111 = vector.load %arg11[%c0_53, %c0_54] : memref<1x32xf32, #tpu.memory_space<vmem>>, vector<1x32xf32>
    %112 = vector.broadcast %111 : vector<1x32xf32> to vector<16x32xf32>
    %113 = arith.addf %110, %112 : vector<16x32xf32>
    %114 = arith.addf %113, %0 : vector<16x32xf32>
    %cst_55 = arith.constant dense<0.000000e+00> : vector<16xf32>
    %115 = vector.multi_reduction <add>, %114, %cst_55 [1] : vector<16x32xf32> to vector<16xf32>
    %116 = vector.shape_cast %115 : vector<16xf32> to vector<16x1xf32>
    %cst_56 = arith.constant 3.200000e+01 : f32
    %117 = vector.broadcast %cst_56 : f32 to vector<16x1xf32>
    %118 = arith.divf %116, %117 : vector<16x1xf32>
    %119 = vector.broadcast %118 : vector<16x1xf32> to vector<16x32xf32>
    %120 = arith.subf %114, %119 : vector<16x32xf32>
    %121 = vector.broadcast %118 : vector<16x1xf32> to vector<16x32xf32>
    %122 = arith.subf %114, %121 : vector<16x32xf32>
    %123 = arith.mulf %120, %122 : vector<16x32xf32>
    %cst_57 = arith.constant dense<0.000000e+00> : vector<16xf32>
    %124 = vector.multi_reduction <add>, %123, %cst_57 [1] : vector<16x32xf32> to vector<16xf32>
    %125 = vector.shape_cast %124 : vector<16xf32> to vector<16x1xf32>
    %cst_58 = arith.constant 3.200000e+01 : f32
    %126 = vector.broadcast %cst_58 : f32 to vector<16x1xf32>
    %127 = arith.divf %125, %126 : vector<16x1xf32>
    %128 = vector.broadcast %118 : vector<16x1xf32> to vector<16x32xf32>
    %129 = arith.subf %114, %128 : vector<16x32xf32>
    %cst_59 = arith.constant 9.99999974E-6 : f32
    %130 = vector.broadcast %cst_59 : f32 to vector<16x1xf32>
    %131 = arith.addf %127, %130 : vector<16x1xf32>
    %132 = math.rsqrt %131 : vector<16x1xf32>
    %133 = vector.broadcast %132 : vector<16x1xf32> to vector<16x32xf32>
    %134 = arith.mulf %129, %133 : vector<16x32xf32>
    %c0_60 = arith.constant 0 : index
    %c0_61 = arith.constant 0 : index
    %135 = vector.load %arg12[%c0_60, %c0_61] : memref<1x32xf32, #tpu.memory_space<vmem>>, vector<1x32xf32>
    %136 = vector.broadcast %135 : vector<1x32xf32> to vector<16x32xf32>
    %137 = arith.mulf %134, %136 : vector<16x32xf32>
    %c0_62 = arith.constant 0 : index
    %c0_63 = arith.constant 0 : index
    %138 = vector.load %arg13[%c0_62, %c0_63] : memref<1x32xf32, #tpu.memory_space<vmem>>, vector<1x32xf32>
    %139 = vector.broadcast %138 : vector<1x32xf32> to vector<16x32xf32>
    %140 = arith.addf %137, %139 : vector<16x32xf32>
    %c0_64 = arith.constant 0 : index
    %c0_65 = arith.constant 0 : index
    %141 = vector.load %arg14[%c0_64, %c0_65] : memref<16x32xf32, #tpu.memory_space<vmem>>, vector<16x32xf32>
    tpu.vector_store %arg14[%c0_64, %c0_65], %140 {strides = array<i32>} : memref<16x32xf32, #tpu.memory_space<vmem>>, vector<16x32xf32>,
    return
  }
  func.func @transform_0(%arg0: i32) -> (i32, i32) {
    %c0_i32 = arith.constant 0 : i32
    %c0_i32_0 = arith.constant 0 : i32
    return %arg0, %c0_i32 : i32, i32
  }
  func.func @transform_1(%arg0: i32) -> (i32, i32) {
    %c0_i32 = arith.constant 0 : i32
    %c0_i32_0 = arith.constant 0 : i32
    return %arg0, %c0_i32 : i32, i32
  }
  func.func @transform_2(%arg0: i32) -> (i32, i32) {
    %c0_i32 = arith.constant 0 : i32
    %c0_i32_0 = arith.constant 0 : i32
    return %arg0, %c0_i32 : i32, i32
  }
  func.func @transform_3(%arg0: i32) -> (i32, i32) {
    %c0_i32 = arith.constant 0 : i32
    %c0_i32_0 = arith.constant 0 : i32
    %c0_i32_1 = arith.constant 0 : i32
    return %c0_i32, %c0_i32_0 : i32, i32
  }
  func.func @transform_4(%arg0: i32) -> (i32, i32) {
    %c0_i32 = arith.constant 0 : i32
    %c0_i32_0 = arith.constant 0 : i32
    %c0_i32_1 = arith.constant 0 : i32
    return %c0_i32, %c0_i32_0 : i32, i32
  }
  func.func @transform_5(%arg0: i32) -> (i32, i32) {
    %c0_i32 = arith.constant 0 : i32
    %c0_i32_0 = arith.constant 0 : i32
    %c0_i32_1 = arith.constant 0 : i32
    return %c0_i32, %c0_i32_0 : i32, i32
  }
  func.func @transform_6(%arg0: i32) -> (i32, i32) {
    %c0_i32 = arith.constant 0 : i32
    %c0_i32_0 = arith.constant 0 : i32
    %c0_i32_1 = arith.constant 0 : i32
    return %c0_i32, %c0_i32_0 : i32, i32
  }
  func.func @transform_7(%arg0: i32) -> (i32, i32) {
    %c0_i32 = arith.constant 0 : i32
    %c0_i32_0 = arith.constant 0 : i32
    %c0_i32_1 = arith.constant 0 : i32
    return %c0_i32, %c0_i32_0 : i32, i32
  }
  func.func @transform_8(%arg0: i32) -> (i32, i32) {
    %c0_i32 = arith.constant 0 : i32
    %c0_i32_0 = arith.constant 0 : i32
    %c0_i32_1 = arith.constant 0 : i32
    return %c0_i32, %c0_i32_0 : i32, i32
  }
  func.func @transform_9(%arg0: i32) -> (i32, i32) {
    %c0_i32 = arith.constant 0 : i32
    %c0_i32_0 = arith.constant 0 : i32
    %c0_i32_1 = arith.constant 0 : i32
    return %c0_i32, %c0_i32_0 : i32, i32
  }
  func.func @transform_10(%arg0: i32) -> (i32, i32) {
    %c0_i32 = arith.constant 0 : i32
    %c0_i32_0 = arith.constant 0 : i32
    %c0_i32_1 = arith.constant 0 : i32
    return %c0_i32, %c0_i32_0 : i32, i32
  }
  func.func @transform_11(%arg0: i32) -> (i32, i32) {
    %c0_i32 = arith.constant 0 : i32
    %c0_i32_0 = arith.constant 0 : i32
    %c0_i32_1 = arith.constant 0 : i32
    return %c0_i32, %c0_i32_0 : i32, i32
  }
  func.func @transform_12(%arg0: i32) -> (i32, i32) {
    %c0_i32 = arith.constant 0 : i32
    %c0_i32_0 = arith.constant 0 : i32
    %c0_i32_1 = arith.constant 0 : i32
    return %c0_i32, %c0_i32_0 : i32, i32
  }
  func.func @transform_13(%arg0: i32) -> (i32, i32) {
    %c0_i32 = arith.constant 0 : i32
    %c0_i32_0 = arith.constant 0 : i32
    return %arg0, %c0_i32 : i32, i32
  }
  func.func @transform_14(%arg0: i32) -> (i32, i32, i32, i32) {
    %c0_i32 = arith.constant 0 : i32
    %c0_i32_0 = arith.constant 0 : i32
    %c0_i32_1 = arith.constant 0 : i32
    %c0_i32_2 = arith.constant 0 : i32
    return %arg0, %c0_i32, %c0_i32_0, %c0_i32_1 : i32, i32, i32, i32
  }
}

</mosaic_0001>

<bundles_post_ra>
// kernel: tpu_custom_call.1
= control target key start
LH: loop header
LB: loop body
LE: loop exit
PB: predicated region body
PF: predicated region fallthrough
CT: control target
= control target key end

     0   :  { %20 = vsyncpa [#allocation4], 0  ;;  %s2938_s0 = inlined_call_operand.hbm [shape: f32[16,32], index: 0, kind: input, shape index: {}]   ;;  %s2939_s1 = inlined_call_operand.hbm [shape: f32[16,32], index: 1, kind: input, shape index: {}]   ;;  %s2940_s2 = inlined_call_operand.hbm [shape: f32[16,32], index: 2, kind: input, shape index: {}]   ;;  %s2941_s3 = inlined_call_operand.hbm [shape: f32[32,32], index: 3, kind: input, shape index: {}]   ;;  %s2942_s4 = inlined_call_operand.vmem [shape: f32[1,32], index: 4, kind: input, shape index: {}]   ;;  %s2943_s5 = inlined_call_operand.hbm [shape: f32[32,32], index: 5, kind: input, shape index: {}]   ;;  %s2944_s6 = inlined_call_operand.vmem [shape: f32[1,32], index: 6, kind: input, shape index: {}]   ;;  %s2945_s7 = inlined_call_operand.hbm [shape: f32[32,32], index: 7, kind: input, shape index: {}]   ;;  %s2946_s8 = inlined_call_operand.hbm [shape: f32[1,32], index: 8, kind: input, shape index: {}]   ;;  %s2947_s9 = inlined_call_operand.vmem [shape: f32[32,32], index: 9, kind: input, shape index: {}]   ;;  %s2948_s10 = inlined_call_operand.vmem [shape: f32[1,32], index: 10, kind: input, shape index: {}]   ;;  %s2949_s11 = inlined_call_operand.vmem [shape: f32[1,32], index: 11, kind: input, shape index: {}]   ;;  %s2950_s12 = inlined_call_operand.vmem [shape: f32[1,32], index: 12, kind: input, shape index: {}]   ;;  %s2951_s13 = inlined_call_operand.hbm [shape: f32[16,32], index: 13, kind: output, shape index: {0}]   ;;  %s2952_s14 = inlined_call_operand.hbm [shape: f32[2,4,8,8], index: 14, kind: output, shape index: {1}]  }
   0x1   :  { %21 = vsyncpa [#allocation7], 0 }
   0x2   :  { %22 = vsyncpa [#allocation10], 0 }
   0x3   :  { %23 = vsyncpa [#allocation13], 0 }
   0x4   :  { %24 = vsyncpa [#allocation5], 0 }
   0x5   :  { %25 = vsyncpa [#allocation17], 0  ;;  %s2481_s29 = smov [#allocation6]   ;;  %s2482_s15 = smov [#allocation9]  }
   0x6   :  { %s43_s30 = sshll.u32 %s2481_s29, 4  ;;  %s67_s16 = sshll.u32 %s2482_s15, 4  ;;  %s44_s30 = int_to_ptr.vmem [resolvable:$true] %s43_s30  ;;  %s2574_s16 = int_to_ptr.vmem [resolvable:$true] %s67_s16 }
   0x7   :  { %s2271_s19 = scalar_lea.hbm %s2939_s1, 256 }
   0x8   :  { %p2272_p0 = scmp.ne.s32.totalorder %s2939_s1, %s2271_s19  ;;  %p2275_p1 = scmp.lt.u32.totalorder %s2271_s19, %s2939_s1 }
   0xa   :  { %p2277_p2 = pnand %p2275_p1, %p2272_p0 }
   0xc   :  { %2280 = shalt.err (!%p2277_p2)
}
   0xd   :  { %s2281_s24 = scalar_lea.vmem %s44_s30, 256  ;;  %p2286_p4 = scmp.lt.s32.totalorder %s44_s30, %s44_s30 }
   0xe   :  { %p2282_p3 = scmp.ne.s32.totalorder %s44_s30, %s2281_s24  ;;  %p2287_p5 = scmp.lt.s32.totalorder %s2281_s24, %s2281_s24 }
  0x10   :  { %p2288_p6 = por %p2287_p5, %p2286_p4 }
  0x12   :  { %p2289_p7 = pnand %p2288_p6, %p2282_p3 }
  0x14   :  { %2292 = shalt.err (!%p2289_p7)
}
  0x15   :  { %s2483_s25 = smov 128   ;;  %s2484_s26 = smov 8  }
  0x16   :  { %49 = dma.hbm_to_vmem [thread:$0]  %s2939_s1, 256, %s44_s30, [#allocation7], %s2483_s25, %s2483_s25, %s2484_s26  }
  0x17   :  { %s2293_s17 = scalar_lea.hbm %s2941_s3, 512 }
  0x18   :  { %p2294_p8 = scmp.ne.s32.totalorder %s2941_s3, %s2293_s17  ;;  %p2297_p9 = scmp.lt.u32.totalorder %s2293_s17, %s2941_s3 }
  0x1a   :  { %p2299_p10 = pnand %p2297_p9, %p2294_p8 }
  0x1c   :  { %2302 = shalt.err (!%p2299_p10)
}
  0x1d   :  { %s2303_s22 = scalar_lea.vmem %s2574_s16, 512  ;;  %p2308_p12 = scmp.lt.s32.totalorder %s2574_s16, %s2574_s16 }
  0x1e   :  { %p2304_p11 = scmp.ne.s32.totalorder %s2574_s16, %s2303_s22  ;;  %p2309_p13 = scmp.lt.s32.totalorder %s2303_s22, %s2303_s22 }
  0x20   :  { %p2310_p0 = por %p2309_p13, %p2308_p12 }
  0x22   :  { %p2311_p1 = pnand %p2310_p0, %p2304_p11 }
  0x24   :  { %2314 = shalt.err (!%p2311_p1)
}
  0x25   :  { %73 = dma.hbm_to_vmem [thread:$0]  %s2941_s3, 512, %s2574_s16, [#allocation10], %s2483_s25, %s2483_s25, %s2484_s26  }
  0x26   :  { %s2485_s23 = smov [#allocation12]   ;;  %s2486_s27 = smov [#allocation3]  }
  0x27   :  { %s95_s24 = sshll.u32 %s2485_s23, 4  ;;  %s31_s28 = sshll.u32 %s2486_s27, 4  ;;  %s96_s24 = int_to_ptr.vmem [resolvable:$true] %s95_s24  ;;  %s2611_s28 = int_to_ptr.vmem [resolvable:$true] %s31_s28 }
  0x28   :  { %s2315_s17 = scalar_lea.hbm %s2945_s7, 512 }
  0x29   :  { %p2316_p2 = scmp.ne.s32.totalorder %s2945_s7, %s2315_s17  ;;  %p2319_p3 = scmp.lt.u32.totalorder %s2315_s17, %s2945_s7 }
  0x2b   :  { %p2321_p4 = pnand %p2319_p3, %p2316_p2 }
  0x2d   :  { %2324 = shalt.err (!%p2321_p4)
}
  0x2e   :  { %s2325_s3 = scalar_lea.vmem %s96_s24, 512  ;;  %p2330_p6 = scmp.lt.s32.totalorder %s96_s24, %s96_s24 }
  0x2f   :  { %p2326_p5 = scmp.ne.s32.totalorder %s96_s24, %s2325_s3  ;;  %p2331_p7 = scmp.lt.s32.totalorder %s2325_s3, %s2325_s3 }
  0x31   :  { %p2332_p8 = por %p2331_p7, %p2330_p6 }
  0x33   :  { %p2333_p9 = pnand %p2332_p8, %p2326_p5 }
  0x35   :  { %2336 = shalt.err (!%p2333_p9)
}
  0x36   :  { %101 = dma.hbm_to_vmem [thread:$0]  %s2945_s7, 512, %s96_s24, [#allocation13], %s2483_s25, %s2483_s25, %s2484_s26  }
  0x37   :  { %s2337_s23 = scalar_lea.hbm %s2938_s0, 256 }
  0x38   :  { %p2338_p10 = scmp.ne.s32.totalorder %s2938_s0, %s2337_s23  ;;  %p2341_p11 = scmp.lt.u32.totalorder %s2337_s23, %s2938_s0 }
  0x3a   :  { %p2343_p12 = pnand %p2341_p11, %p2338_p10 }
  0x3c   :  { %2346 = shalt.err (!%p2343_p12)
}
  0x3d   :  { %s2347_s18 = scalar_lea.vmem %s2611_s28, 256  ;;  %p2352_p0 = scmp.lt.s32.totalorder %s2611_s28, %s2611_s28 }
  0x3e   :  { %p2348_p13 = scmp.ne.s32.totalorder %s2611_s28, %s2347_s18  ;;  %p2353_p1 = scmp.lt.s32.totalorder %s2347_s18, %s2347_s18 }
  0x40   :  { %p2354_p2 = por %p2353_p1, %p2352_p0 }
  0x42   :  { %p2355_p3 = pnand %p2354_p2, %p2348_p13 }
  0x44   :  { %2358 = shalt.err (!%p2355_p3)
}
  0x45   :  { %37 = dma.hbm_to_vmem [thread:$0]  %s2938_s0, 256, %s2611_s28, [#allocation4], %s2483_s25, %s2483_s25, %s2484_s26  }
  0x46   :  { %s2487_s19 = smov [#allocation8]   ;;  %s2488_s21 = smov [#allocation11]  }
  0x47   :  { %s55_s20 = sshll.u32 %s2487_s19, 4  ;;  %s81_s3 = sshll.u32 %s2488_s21, 4  ;;  %s56_s20 = int_to_ptr.vmem [resolvable:$true] %s55_s20  ;;  %s2648_s3 = int_to_ptr.vmem [resolvable:$true] %s81_s3 }
  0x48   :  { %s2359_s1 = scalar_lea.hbm %s2940_s2, 256 }
  0x49   :  { %p2360_p4 = scmp.ne.s32.totalorder %s2940_s2, %s2359_s1  ;;  %p2363_p5 = scmp.lt.u32.totalorder %s2359_s1, %s2940_s2 }
  0x4b   :  { %p2365_p6 = pnand %p2363_p5, %p2360_p4 }
  0x4d   :  { %2368 = shalt.err (!%p2365_p6)
}
  0x4e   :  { %s2369_s0 = scalar_lea.vmem %s56_s20, 256  ;;  %p2374_p8 = scmp.lt.s32.totalorder %s56_s20, %s56_s20 }
  0x4f   :  { %p2370_p7 = scmp.ne.s32.totalorder %s56_s20, %s2369_s0  ;;  %p2375_p9 = scmp.lt.s32.totalorder %s2369_s0, %s2369_s0 }
  0x51   :  { %p2376_p10 = por %p2375_p9, %p2374_p8 }
  0x53   :  { %p2377_p11 = pnand %p2376_p10, %p2370_p7 }
  0x55   :  { %2380 = shalt.err (!%p2377_p11)
}
  0x56   :  { %61 = dma.hbm_to_vmem [thread:$0]  %s2940_s2, 256, %s56_s20, [#allocation7], %s2483_s25, %s2483_s25, %s2484_s26  }
  0x57   :  { %s2381_s7 = scalar_lea.hbm %s2943_s5, 512 }
  0x58   :  { %p2382_p12 = scmp.ne.s32.totalorder %s2943_s5, %s2381_s7  ;;  %p2385_p13 = scmp.lt.u32.totalorder %s2381_s7, %s2943_s5 }
  0x5a   :  { %p2387_p0 = pnand %p2385_p13, %p2382_p12 }
  0x5c   :  { %2390 = shalt.err (!%p2387_p0)
}
  0x5d   :  { %s2391_s22 = scalar_lea.vmem %s2648_s3, 512  ;;  %p2396_p2 = scmp.lt.s32.totalorder %s2648_s3, %s2648_s3 }
  0x5e   :  { %p2392_p1 = scmp.ne.s32.totalorder %s2648_s3, %s2391_s22  ;;  %p2397_p3 = scmp.lt.s32.totalorder %s2391_s22, %s2391_s22 }
  0x60   :  { %p2398_p4 = por %p2397_p3, %p2396_p2 }
  0x62   :  { %p2399_p5 = pnand %p2398_p4, %p2392_p1 }
  0x64   :  { %2402 = shalt.err (!%p2399_p5)
}
  0x65   :  { %87 = dma.hbm_to_vmem [thread:$0]  %s2943_s5, 512, %s2648_s3, [#allocation10], %s2483_s25, %s2483_s25, %s2484_s26  }
  0x66   :  { %s2489_s1 = smov [#allocation14]   ;;  %s2403_s29 = scalar_lea.hbm %s2946_s8, 16 }
  0x67   :  { %s108_s30 = sshll.u32 %s2489_s1, 4  ;;  %p2404_p6 = scmp.ne.s32.totalorder %s2946_s8, %s2403_s29  ;;  %s109_s30 = int_to_ptr.vmem [resolvable:$true] %s108_s30 }
  0x68   :  { %p2407_p7 = scmp.lt.u32.totalorder %s2403_s29, %s2946_s8 }
  0x6a   :  { %p2409_p8 = pnand %p2407_p7, %p2404_p6 }
  0x6c   :  { %2412 = shalt.err (!%p2409_p8)
}
  0x6d   :  { %s2413_s18 = scalar_lea.vmem %s109_s30, 16  ;;  %s2417_s5 = scalar_lea.vmem %s109_s30, 32 }
  0x6e   :  { %p2414_p9 = scmp.ne.s32.totalorder %s109_s30, %s2413_s18  ;;  %p2418_p10 = scmp.lt.s32.totalorder %s109_s30, %s109_s30 }
  0x6f   :  { %p2419_p11 = scmp.lt.s32.totalorder %s2417_s5, %s2413_s18 }
  0x71   :  { %p2420_p12 = por %p2419_p11, %p2418_p10 }
  0x73   :  { %p2421_p13 = pnand %p2420_p12, %p2414_p9 }
  0x75   :  { %2424 = shalt.err (!%p2421_p13)
}
  0x76   :  { %111 = dma.hbm_to_vmem [thread:$0]  %s2946_s8, 16, %s109_s30, [#allocation13]  }
  0x77   :  { %2469 = dma.done.wait [#allocation4], 256  }
  0x78   :  { %2470 = vsyncadd [#allocation4], 4294967040 }
  0x79   :  { %2471 = dma.done.wait [#allocation7], 512  }
  0x7a   :  { %2472 = vsyncadd [#allocation7], 4294966784 }
  0x7b   :  { %2473 = dma.done.wait [#allocation10], 1024  }
  0x7c   :  { %2474 = vsyncadd [#allocation10], 4294966272 }
  0x7d   :  { %2475 = dma.done.wait [#allocation13], 528  }
  0x7e   :  { %2476 = vsyncadd [#allocation13], 4294966768  ;;  %v240_v0 = vld [vmem:[#allocation11] sm:$0xff]  ;;  %v241_v1 = vld [vmem:[#allocation11 + $0x8] sm:$0xff]  ;;  %vm158_vm0 = vcmask 261120   ;;  %v2490_v16 = vmov 0.0  }
  0x7f   :  { %v147_v2 = vld [vmem:[#allocation9] sm:$0xff]  ;;  %v2193_v3 = vpack.c.bf16 %v241_v1, %v240_v0  ;;  %v148_v4 = vld [vmem:[#allocation9 + $0x8] sm:$0xff]  ;;  %v242_v5 = vld [vmem:[#allocation11 + $0x10] sm:$0xff]  ;;  %vm2491_vm1 = vmmov 0   ;;  %vm424_vm2 = vcmask 64512   ;;  %s2492_s16 = smov 120  }
  0x80   :  { %v243_v6 = vld [vmem:[#allocation11 + $0x18] sm:$0xff]  ;;  %v2185_v7 = vpack.c.bf16 %v148_v4, %v147_v2  ;;  %v149_v9 = vld [vmem:[#allocation9 + $0x10] sm:$0xff]  ;;  %v143_v11 = vld [vmem:[#allocation6] sm:$0xff]  ;;  %s2495_s22 = smov 16   ;;  %vm1091_vm3 = vcmask 130112   ;;  %vm1434_vm4 = vcmask 195712  }
  0x81   :  { %v2197_v8 = vpack.c.bf16 %v243_v6, %v242_v5  ;;  %v150_v10 = vld [vmem:[#allocation9 + $0x18] sm:$0xff]  ;;  %2194 = vmatprep.subr.bf16.mxu1 %v2193_v3  ;;  %2080 = vmatprep.mubr.msk.f32.mxu1 %vm158_vm0, %v143_v11  ;;  %v2698_v13 = vld [vmem:[#allocation3] sm:$0xff]  ;;  %v144_v14 = vld [vmem:[#allocation6 + $0x8] sm:$0xff]  ;;  %s2496_s28 = smov 24   ;;  %vm1777_vm5 = vcmask 261312  }
  0x82   :  { %v2189_v12 = vpack.c.bf16 %v150_v10, %v149_v9  ;;  %2196 = vmatpush3.bf16.msra.mxu1 %v2193_v3  ;;  %2186 = vmatprep.subr.bf16.mxu0 %v2185_v7  ;;  %v2702_v15 = vld [vmem:[#allocation3 + $0x8] sm:$0xff]  ;;  %v1970_v17 = vld [vmem:[%s2944_s6] ss:$0 sm:$0xff]  ;;  %v333_v28 = vld [vmem:[#allocation12 + $0x8] sm:$0xff]  ;;  %s2494_s6 = smov 104  }
  0x83   :  { %2188 = vmatpush3.bf16.msra.mxu0 %v2185_v7  ;;  %2198 = vmatprep.subr.bf16.mxu1 %v2197_v8  ;;  %v1967_v19 = vld [vmem:[%s2942_s4] ss:$0 sm:$0xff]  ;;  %v334_v29 = vld [vmem:[#allocation12 + $0x10] sm:$0xff]  ;;  %v335_v31 = vld [vmem:[#allocation12 + $0x18] sm:$0xff]  ;;  %s2493_s4 = smov 112  }
  0x84   :  { %2190 = vmatprep.subr.bf16.mxu0 %v2189_v12  ;;  %2069 = vmatprep.mubr.msk.f32.mxu0 %vm158_vm0, %v2698_v13  ;;  %v332_v27 = vld [vmem:[#allocation12] sm:$0xff]  ;;  %v145_v32 = vld [vmem:[#allocation8] sm:$0xff]  ;;  %v2205_v33 = vpack.c.bf16 %v335_v31, %v334_v29  ;;  %v146_v34 = vld [vmem:[#allocation8 + $0x8] sm:$0xff] }
  0x85   :  { %v2201_v30 = vpack.c.bf16 %v333_v28, %v332_v27  ;;  %v1973_v57 = vld [vmem:[#allocation14] ss:$0 sm:$0xff] }
  0x86   :  { %2200 = vmatpush3.bf16.msra.mxu1 %v2197_v8 }
  0x87   :  { %2192 = vmatpush3.bf16.msra.mxu0 %v2189_v12  ;;  %2094 = vmatprep.subr.mxu1 %v2490_v16 }
  0x88   :  { %2202 = vmatprep.subr.bf16.mxu0 %v2201_v30 }
  0x89   :  { %2081 = vmatmul.mubr.msk.f32.vlgmr.msra.gmra.mrb[0].mxu1 %vm158_vm0, %v144_v14 }
  0x8a   :  { %2070 = vmatmul.mubr.msk.f32.vlgmr.msra.gmra.mrb[0].mxu0 %vm158_vm0, %v2702_v15  ;;  %2096 = vmatprep.mubr.msk.f32.mxu1 %vm2491_vm1, %v2490_v16 }
  0x8b   :  { %2091 = vmatprep.mubr.msk.f32.mxu0 %vm158_vm0, %v145_v32  ;;  %2204 = vmatpush3.bf16.msra.mxu0 %v2201_v30 }
  0x8c   :  { %2206 = vmatprep.subr.bf16.mxu0 %v2205_v33 }
  0x8f   :  { %2208 = vmatpush3.bf16.msra.mxu0 %v2205_v33 }
  0x90   :  { %2114 = vmatprep.subr.mxu0 %v2490_v16 }
  0x92   :  { %2092 = vmatmul.mubr.msk.f32.vlgmr.msra.gmra.mrb[2].mxu0 %vm158_vm0, %v146_v34 }
  0x93   :  { %2116 = vmatprep.mubr.msk.f32.mxu0 %vm2491_vm1, %v2490_v16 }
 0x15c   :  { %v2082_v18 = vpop.f32.mrb[0].mxu1 }
 0x15d   :  { %v2716_v20 = vadd.f32 %v2082_v18, %v1970_v17  ;;  %v323_v21 = vpop.f32.mrb[1].mxu1  ;;  %v2071_v22 = vpop.f32.mrb[0].mxu0 }
 0x15e   :  { %v2718_v23 = vadd.f32 %v1970_v17, %v323_v21  ;;  %v231_v24 = vpop.f32.mrb[1].mxu0  ;;  %v2735_v26 = vadd.f32 %v2071_v22, %v1967_v19 }
 0x15f   :  { %829 = vrot.lane.b32.xlu1 %v2716_v20, %s2492_s16  ;;  %v2722_v25 = vadd.f32 %v1967_v19, %v231_v24 }
 0x160   :  { %2095 = vmatpush3.xpose.msk.msra.mxu1 %vm424_vm2, %v2718_v23 }
 0x161   :  { %2099 = vmatprep.subr.mxu1 %v2490_v16 }
 0x163   :  { %749 = vrot.lane.b32.xlu1 %v2722_v25, %s2492_s16  ;;  %2097 = vmatmul.mubr.msk.f32.vlgmr.msra.gmra.mrb[2].mxu1 %vm424_vm2, %v2722_v25 }
 0x164   :  { %2100 = vmatpush3.xpose.msk.msra.mxu1 %vm424_vm2, %v2716_v20  ;;  %2101 = vmatprep.mubr.msk.f32.mxu1 %vm2491_vm1, %v2490_v16 }
 0x165   :  { %2104 = vmatprep.subr.mxu1 %v2490_v16  ;;  %v2093_v56 = vpop.f32.mrb[2].mxu0 }
 0x166   :  { %v415_v58 = vpop.f32.mrb[3].mxu0  ;;  %v2760_v59 = vadd.f32 %v2093_v56, %v1973_v57 }
 0x167   :  { %2102 = vmatmul.mubr.msk.f32.vlgmr.msra.gmra.mrb[4].mxu1 %vm424_vm2, %v2735_v26  ;;  %v2762_v60 = vadd.f32 %v1973_v57, %v415_v58 }
 0x168   :  { %2106 = vmatprep.mubr.msk.f32.mxu1 %vm2491_vm1, %v2490_v16 }
 0x169   :  { %2105 = vmatpush3.msra.mxu1 %v2762_v60 }
 0x16a   :  { %2109 = vmatprep.subr.mxu1 %v2490_v16 }
 0x1d1   :  { %v830_v47 = vpop.permute.xlu1 %829 }
 0x1d5   :  { %v750_v51 = vpop.permute.xlu1 %749 }
 0x236   :  { %v497_v35 = vpop.f32.mrb[2].mxu1 }
 0x237   :  { %v577_v36 = vmul.f32 0.35355338, %v497_v35  ;;  %v2098_v37 = vpop.f32.mrb[3].mxu1 }
 0x239   :  { %v579_v38 = vsel %vm424_vm2, %v577_v36, -inf }
 0x23a   :  { %580 = vmax.xlane.f32.xlu0 %v579_v38  ;;  %v573_v39 = vpop.f32.mrb[4].mxu1 }
 0x23b   :  { %v578_v40 = vmul.f32 0.35355338, %v573_v39  ;;  %v2103_v41 = vpop.f32.mrb[5].mxu1 }
 0x23d   :  { %v582_v42 = vsel %vm424_vm2, %v578_v40, -inf }
 0x23e   :  { %583 = vmax.xlane.f32.xlu0 %v582_v42 }
 0x254   :  { %751 = vrot.lane.b32.xlu0 %v2718_v23, %s2492_s16 }
 0x2c7   :  { %v581_v43 = vpop.xlane.xlu0 %580 }
 0x2c8   :  { %v585_v44 = vsub.f32 %v577_v36, %v581_v43 }
 0x2ca   :  { %v587_v45 = vmul.f32 1.442695, %v585_v44 }
 0x2cb   :  { %v584_v46 = vpop.xlane.xlu0 %583 }
 0x2cc   :  { %2235 = vpow2.f32 %v587_v45  ;;  %v586_v48 = vsub.f32 %v578_v40, %v584_v46 }
 0x2ce   :  { %v589_v49 = vmul.f32 1.442695, %v586_v48 }
 0x2cf   :  { %v752_v50 = vpop.permute.xlu0 %751 }
 0x2d0   :  { %2237 = vpow2.f32 %v589_v49  ;;  %2115 = vmatpush3.xpose.msk.msra.mxu0 %vm424_vm2, %v752_v50 }
 0x2d1   :  { %2124 = vmatprep.subr.mxu0 %v2490_v16 }
 0x2d3   :  { %2117 = vmatmul.mubr.msk.f32.vlgmr.msra.gmra.mrb[4].mxu0 %vm424_vm2, %v750_v51 }
 0x2d4   :  { %2126 = vmatprep.mubr.msk.f32.mxu0 %vm2491_vm1, %v2490_v16 }
 0x2d6   :  { %v2236_v52 = vpop.eup %2235 }
 0x2d7   :  { %v591_v53 = vsel %vm424_vm2, %v2236_v52, 0.0 }
 0x2d8   :  { %592 = vadd.xlane.f32.xlu1 %v591_v53 }
 0x2da   :  { %v2238_v54 = vpop.eup %2237 }
 0x2db   :  { %v594_v55 = vsel %vm424_vm2, %v2238_v54, 0.0 }
 0x2dc   :  { %595 = vadd.xlane.f32.xlu1 %v594_v55 }
 0x2ed   :  { %827 = vrot.lane.b32.xlu1 %v2735_v26, %s2492_s16 }
 0x365   :  { %v593_v61 = vpop.xlane.xlu1 %592 }
 0x366   :  { %2239 = vrcp.f32 %v593_v61 }
 0x369   :  { %v596_v62 = vpop.xlane.xlu1 %595 }
 0x36a   :  { %2241 = vrcp.f32 %v596_v62 }
 0x36d   :  { %v828_v3 = vpop.permute.xlu1 %827 }
 0x370   :  { %v2240_v63 = vpop.eup %2239 }
 0x371   :  { %v598_v0 = vmul.f32 %v2240_v63, %v2236_v52 }
 0x373   :  { %1780 = vst.msk [vmem:[#allocation16] sm:$0xff] %vm424_vm2, %v598_v0  ;;  %2107 = vmatmul.mubr.msk.f32.vlgmr.msra.gmra.mrb[6].mxu1 %vm424_vm2, %v598_v0 }
 0x374   :  { %v2242_v1 = vpop.eup %2241  ;;  %2110 = vmatpush3.msra.mxu1 %v2760_v59  ;;  %2111 = vmatprep.mubr.msk.f32.mxu1 %vm2491_vm1, %v2490_v16 }
 0x375   :  { %v600_v2 = vmul.f32 %v2242_v1, %v2238_v54  ;;  %2119 = vmatprep.subr.mxu1 %v2490_v16 }
 0x377   :  { %1784 = vst.msk [vmem:[#allocation16 + $0x20] sm:$0xff] %vm424_vm2, %v600_v2  ;;  %2112 = vmatmul.mubr.msk.f32.vlgmr.msra.gmra.mrb[8].mxu1 %vm424_vm2, %v600_v2 }
 0x378   :  { %2121 = vmatprep.mubr.msk.f32.mxu1 %vm2491_vm1, %v2490_v16 }
 0x37b   :  { %2120 = vmatpush3.xpose.msk.msra.mxu1 %vm424_vm2, %v830_v47 }
 0x37c   :  { %2129 = vmatprep.subr.mxu1 %v2490_v16 }
 0x37e   :  { %2122 = vmatmul.mubr.msk.f32.vlgmr.msra.gmra.mrb[10].mxu1 %vm424_vm2, %v828_v3 }
 0x37f   :  { %2131 = vmatprep.mubr.msk.f32.mxu1 %vm2491_vm1, %v2490_v16 }
 0x3a6   :  { %v823_v4 = vpop.f32.mrb[4].mxu0 }
 0x3a7   :  { %v905_v5 = vmul.f32 0.35355338, %v823_v4  ;;  %v2118_v6 = vpop.f32.mrb[5].mxu0 }
 0x3a9   :  { %v907_v7 = vsel %vm424_vm2, %v905_v5, -inf }
 0x3aa   :  { %908 = vmax.xlane.f32.xlu0 %v907_v7 }
 0x437   :  { %v909_v8 = vpop.xlane.xlu0 %908 }
 0x438   :  { %v913_v9 = vsub.f32 %v905_v5, %v909_v8 }
 0x43a   :  { %v915_v10 = vmul.f32 1.442695, %v913_v9 }
 0x43c   :  { %2243 = vpow2.f32 %v915_v10 }
 0x446   :  { %v2244_v11 = vpop.eup %2243  ;;  %v670_v12 = vpop.f32.mrb[6].mxu1 }
 0x447   :  { %747 = vst.msk [vmem:[#allocation2] sm:$0xff] %vm424_vm2, %v670_v12  ;;  %v2108_v14 = vpop.f32.mrb[7].mxu1  ;;  %v919_v17 = vsel %vm424_vm2, %v2244_v11, 0.0 }
 0x448   :  { %920 = vadd.xlane.f32.xlu0 %v919_v17 }
 0x44a   :  { %v743_v18 = vpop.f32.mrb[8].mxu1 }
 0x44b   :  { %748 = vst.msk [vmem:[#allocation2 + $0x8] sm:$0xff] %vm424_vm2, %v743_v18  ;;  %v2113_v19 = vpop.f32.mrb[9].mxu1 }
 0x451   :  { %v901_v21 = vpop.f32.mrb[10].mxu1 }
 0x452   :  { %v906_v22 = vmul.f32 0.35355338, %v901_v21  ;;  %v2123_v24 = vpop.f32.mrb[11].mxu1 }
 0x454   :  { %v910_v27 = vsel %vm424_vm2, %v906_v22, -inf }
 0x455   :  { %911 = vmax.xlane.f32.xlu1 %v910_v27 }
 0x45e   :  { %930 = vrot.lane.b32.xlu0 %v2762_v60, %s2492_s16 }
 0x466   :  { %1007 = vrot.lane.b32.xlu1 %v2760_v59, %s2492_s16 }
 0x46a   :  { %1096 = vrot.lane.b32.xlu1 %v2718_v23, %s2493_s4 }
 0x46e   :  { %1174 = vrot.lane.b32.xlu1 %v2716_v20, %s2493_s4 }
 0x472   :  { %1172 = vrot.lane.b32.xlu1 %v2735_v26, %s2493_s4 }
 0x4d5   :  { %v921_v28 = vpop.xlane.xlu0 %920 }
 0x4d6   :  { %2245 = vrcp.f32 %v921_v28 }
 0x4d9   :  { %v931_v29 = vpop.permute.xlu0 %930 }
 0x4da   :  { %2125 = vmatpush3.msra.mxu0 %v931_v29 }
 0x4db   :  { %2134 = vmatprep.subr.mxu0 %v2490_v16 }
 0x4e0   :  { %v2246_v30 = vpop.eup %2245 }
 0x4e1   :  { %v926_v31 = vmul.f32 %v2246_v30, %v2244_v11 }
 0x4e2   :  { %v912_v32 = vpop.xlane.xlu1 %911 }
 0x4e3   :  { %1781 = vst.msk [vmem:[#allocation16 + $0x8] sm:$0xff] %vm424_vm2, %v926_v31  ;;  %v914_v33 = vsub.f32 %v906_v22, %v912_v32  ;;  %2127 = vmatmul.mubr.msk.f32.vlgmr.msra.gmra.mrb[6].mxu0 %vm424_vm2, %v926_v31 }
 0x4e4   :  { %2136 = vmatprep.mubr.msk.f32.mxu0 %vm2491_vm1, %v2490_v16 }
 0x4e5   :  { %v917_v34 = vmul.f32 1.442695, %v914_v33 }
 0x4e6   :  { %v1008_v35 = vpop.permute.xlu1 %1007 }
 0x4e7   :  { %2247 = vpow2.f32 %v917_v34  ;;  %2130 = vmatpush3.msra.mxu1 %v1008_v35 }
 0x4e8   :  { %2139 = vmatprep.subr.mxu1 %v2490_v16 }
 0x4ea   :  { %v1097_v36 = vpop.permute.xlu1 %1096 }
 0x4eb   :  { %2135 = vmatpush3.xpose.msk.msra.mxu0 %vm424_vm2, %v1097_v36 }
 0x4ec   :  { %2144 = vmatprep.subr.mxu0 %v2490_v16 }
 0x4ee   :  { %v1175_v42 = vpop.permute.xlu1 %1174 }
 0x4f1   :  { %v2248_v37 = vpop.eup %2247 }
 0x4f2   :  { %v922_v38 = vsel %vm424_vm2, %v2248_v37, 0.0  ;;  %v1173_v44 = vpop.permute.xlu1 %1172 }
 0x4f3   :  { %923 = vadd.xlane.f32.xlu0 %v922_v38 }
 0x509   :  { %1094 = vrot.lane.b32.xlu0 %v2722_v25, %s2493_s4 }
 0x580   :  { %v924_v39 = vpop.xlane.xlu0 %923 }
 0x581   :  { %2249 = vrcp.f32 %v924_v39 }
 0x584   :  { %v1095_v40 = vpop.permute.xlu0 %1094 }
 0x585   :  { %2137 = vmatmul.mubr.msk.f32.vlgmr.msra.gmra.mrb[8].mxu0 %vm424_vm2, %v1095_v40 }
 0x586   :  { %2146 = vmatprep.mubr.msk.f32.mxu0 %vm2491_vm1, %v2490_v16 }
 0x58b   :  { %v2250_v41 = vpop.eup %2249 }
 0x58c   :  { %v928_v43 = vmul.f32 %v2250_v41, %v2248_v37 }
 0x58e   :  { %1785 = vst.msk [vmem:[#allocation16 + $0x28] sm:$0xff] %vm424_vm2, %v928_v43  ;;  %2132 = vmatmul.mubr.msk.f32.vlgmr.msra.gmra.mrb[12].mxu1 %vm424_vm2, %v928_v43 }
 0x58f   :  { %2140 = vmatpush3.xpose.msk.msra.mxu1 %vm424_vm2, %v1175_v42  ;;  %2141 = vmatprep.mubr.msk.f32.mxu1 %vm2491_vm1, %v2490_v16 }
 0x590   :  { %2149 = vmatprep.subr.mxu1 %v2490_v16 }
 0x592   :  { %2142 = vmatmul.mubr.msk.f32.vlgmr.msra.gmra.mrb[14].mxu1 %vm424_vm2, %v1173_v44 }
 0x593   :  { %2151 = vmatprep.mubr.msk.f32.mxu1 %vm2491_vm1, %v2490_v16 }
 0x5b6   :  { %v2819_v45 = vpop.f32.mrb[6].mxu0 }
 0x5b7   :  { %v2128_v46 = vpop.f32.mrb[7].mxu0 }
 0x658   :  { %v1168_v47 = vpop.f32.mrb[8].mxu0 }
 0x659   :  { %v1250_v48 = vmul.f32 0.35355338, %v1168_v47  ;;  %v2138_v49 = vpop.f32.mrb[9].mxu0 }
 0x65b   :  { %v1252_v50 = vsel %vm424_vm2, %v1250_v48, -inf }
 0x65c   :  { %1253 = vmax.xlane.f32.xlu0 %v1252_v50 }
 0x661   :  { %v2822_v51 = vpop.f32.mrb[12].mxu1 }
 0x662   :  { %v2133_v52 = vpop.f32.mrb[13].mxu1 }
 0x663   :  { %v1791_v52 = vld [vmem:[%s2947_s9 + $0x8] sm:$0xff] }
 0x665   :  { %v1246_v53 = vpop.f32.mrb[14].mxu1 }
 0x666   :  { %v1251_v54 = vmul.f32 0.35355338, %v1246_v53  ;;  %v2143_v55 = vpop.f32.mrb[15].mxu1 }
 0x667   :  { %v1793_v55 = vld [vmem:[%s2947_s9 + $0x18] sm:$0xff] }
 0x668   :  { %v1255_v56 = vsel %vm424_vm2, %v1251_v54, -inf }
 0x669   :  { %1256 = vmax.xlane.f32.xlu1 %v1255_v56 }
 0x67a   :  { %1350 = vrot.lane.b32.xlu1 %v2760_v59, %s2493_s4 }
 0x67e   :  { %1439 = vrot.lane.b32.xlu1 %v2718_v23, %s2494_s6 }
 0x682   :  { %1517 = vrot.lane.b32.xlu1 %v2716_v20, %s2494_s6 }
 0x686   :  { %1515 = vrot.lane.b32.xlu1 %v2735_v26, %s2494_s6 }
 0x6e9   :  { %v1254_v57 = vpop.xlane.xlu0 %1253 }
 0x6ea   :  { %v1258_v58 = vsub.f32 %v1250_v48, %v1254_v57 }
 0x6ec   :  { %v1260_v61 = vmul.f32 1.442695, %v1258_v58 }
 0x6ee   :  { %2251 = vpow2.f32 %v1260_v61 }
 0x6f6   :  { %v1257_v62 = vpop.xlane.xlu1 %1256 }
 0x6f7   :  { %v1259_v20 = vsub.f32 %v1251_v54, %v1257_v62  ;;  %v1792_v54 = vld [vmem:[%s2947_s9 + $0x10] sm:$0xff] }
 0x6f8   :  { %v2252_v63 = vpop.eup %2251  ;;  %v2213_v56 = vpack.c.bf16 %v1793_v55, %v1792_v54 }
 0x6f9   :  { %v1264_v0 = vsel %vm424_vm2, %v2252_v63, 0.0  ;;  %v1262_v23 = vmul.f32 1.442695, %v1259_v20 }
 0x6fa   :  { %1265 = vadd.xlane.f32.xlu0 %v1264_v0  ;;  %v1351_v1 = vpop.permute.xlu1 %1350 }
 0x6fb   :  { %2150 = vmatpush3.msra.mxu1 %v1351_v1  ;;  %2253 = vpow2.f32 %v1262_v23  ;;  %v2000_v23 = vld [vmem:[%s2948_s10] ss:$0 sm:$0xff]  ;;  %s2497_s10 = smov [#allocation16]  }
 0x6fc   :  { %2159 = vmatprep.subr.mxu1 %v2490_v16  ;;  %s1948_s17 = sshll.u32 %s2497_s10, 4  ;;  %s1949_s17 = int_to_ptr.vmem [resolvable:$true] %s1948_s17 }
 0x6fd   :  { %s2425_s18 = scalar_lea.vmem %s1949_s17, 1024  ;;  %p2430_p1 = scmp.lt.s32.totalorder %s1949_s17, %s1949_s17 }
 0x6fe   :  { %v1440_v7 = vpop.permute.xlu1 %1439  ;;  %p2426_p0 = scmp.ne.s32.totalorder %s1949_s17, %s2425_s18  ;;  %p2431_p2 = scmp.lt.s32.totalorder %s2425_s18, %s2425_s18 }
 0x700   :  { %p2432_p3 = por %p2431_p2, %p2430_p1 }
 0x702   :  { %v1518_v10 = vpop.permute.xlu1 %1517  ;;  %p2433_p4 = pnand %p2432_p3, %p2426_p0 }
 0x705   :  { %v2254_v26 = vpop.eup %2253 }
 0x706   :  { %v1267_v2 = vsel %vm424_vm2, %v2254_v26, 0.0  ;;  %v1516_v12 = vpop.permute.xlu1 %1515 }
 0x710   :  { %1274 = vrot.lane.b32.xlu0 %v2762_v60, %s2493_s4 }
 0x72f   :  { %1268 = vadd.xlane.f32.xlu0 %v1267_v2 }
 0x745   :  { %1437 = vrot.lane.b32.xlu0 %v2722_v25, %s2494_s6 }
 0x787   :  { %v1266_v3 = vpop.xlane.xlu0 %1265 }
 0x788   :  { %2255 = vrcp.f32 %v1266_v3 }
 0x78b   :  { %v1275_v4 = vpop.permute.xlu0 %1274 }
 0x78c   :  { %2145 = vmatpush3.msra.mxu0 %v1275_v4 }
 0x78d   :  { %2154 = vmatprep.subr.mxu0 %v2490_v16 }
 0x792   :  { %v2256_v5 = vpop.eup %2255 }
 0x793   :  { %v1271_v6 = vmul.f32 %v2256_v5, %v2252_v63 }
 0x795   :  { %1782 = vst.msk [vmem:[#allocation16 + $0x10] sm:$0xff] %vm424_vm2, %v1271_v6  ;;  %2147 = vmatmul.mubr.msk.f32.vlgmr.msra.gmra.mrb[10].mxu0 %vm424_vm2, %v1271_v6 }
 0x796   :  { %2155 = vmatpush3.xpose.msk.msra.mxu0 %vm424_vm2, %v1440_v7  ;;  %2156 = vmatprep.mubr.msk.f32.mxu0 %vm2491_vm1, %v2490_v16 }
 0x797   :  { %2164 = vmatprep.subr.mxu0 %v2490_v16 }
 0x7bc   :  { %v1269_v25 = vpop.xlane.xlu0 %1268 }
 0x7bd   :  { %2257 = vrcp.f32 %v1269_v25 }
 0x7c0   :  { %v1438_v8 = vpop.permute.xlu0 %1437 }
 0x7c1   :  { %2157 = vmatmul.mubr.msk.f32.vlgmr.msra.gmra.mrb[12].mxu0 %vm424_vm2, %v1438_v8 }
 0x7c2   :  { %2166 = vmatprep.mubr.msk.f32.mxu0 %vm2491_vm1, %v2490_v16 }
 0x7c7   :  { %v2258_v9 = vpop.eup %2257 }
 0x7c8   :  { %v1273_v11 = vmul.f32 %v2258_v9, %v2254_v26 }
 0x7ca   :  { %1786 = vst.msk [vmem:[#allocation16 + $0x30] sm:$0xff] %vm424_vm2, %v1273_v11  ;;  %2152 = vmatmul.mubr.msk.f32.vlgmr.msra.gmra.mrb[16].mxu1 %vm424_vm2, %v1273_v11 }
 0x7cb   :  { %2160 = vmatpush3.xpose.msk.msra.mxu1 %vm424_vm2, %v1518_v10  ;;  %2161 = vmatprep.mubr.msk.f32.mxu1 %vm2491_vm1, %v2490_v16 }
 0x7cc   :  { %2169 = vmatprep.subr.mxu1 %v2490_v16 }
 0x7ce   :  { %2162 = vmatmul.mubr.msk.f32.vlgmr.msra.gmra.mrb[18].mxu1 %vm424_vm2, %v1516_v12 }
 0x7cf   :  { %2171 = vmatprep.mubr.msk.f32.mxu1 %vm2491_vm1, %v2490_v16 }
 0x868   :  { %v1346_v14 = vpop.f32.mrb[10].mxu0 }
 0x869   :  { %v2148_v17 = vpop.f32.mrb[11].mxu0 }
 0x894   :  { %v1511_v18 = vpop.f32.mrb[12].mxu0 }
 0x895   :  { %v1593_v19 = vmul.f32 0.35355338, %v1511_v18  ;;  %v2158_v21 = vpop.f32.mrb[13].mxu0 }
 0x897   :  { %v1595_v22 = vsel %vm424_vm2, %v1593_v19, -inf }
 0x898   :  { %1596 = vmax.xlane.f32.xlu0 %v1595_v22 }
 0x89d   :  { %v1422_v24 = vpop.f32.mrb[16].mxu1 }
 0x89e   :  { %v2153_v27 = vpop.f32.mrb[17].mxu1 }
 0x8a1   :  { %v1589_v28 = vpop.f32.mrb[18].mxu1 }
 0x8a2   :  { %v1594_v29 = vmul.f32 0.35355338, %v1589_v28  ;;  %v2163_v30 = vpop.f32.mrb[19].mxu1 }
 0x8a4   :  { %v1598_v31 = vsel %vm424_vm2, %v1594_v29, -inf }
 0x8a5   :  { %1599 = vmax.xlane.f32.xlu1 %v1598_v31 }
 0x8b6   :  { %1693 = vrot.lane.b32.xlu1 %v2760_v59, %s2494_s6 }
 0x8ba   :  { %1085 = vrot.lane.b32.xlu1 %v2819_v45, %s2484_s26 }
 0x8be   :  { %1087 = vrot.lane.b32.xlu1 %v2822_v51, %s2484_s26 }
 0x8c2   :  { %1430 = vrot.lane.b32.xlu1 %v1422_v24, %s2495_s22 }
 0x925   :  { %v1597_v16 = vpop.xlane.xlu0 %1596 }
 0x926   :  { %v1601_v32 = vsub.f32 %v1593_v19, %v1597_v16 }
 0x928   :  { %v1603_v33 = vmul.f32 1.442695, %v1601_v32 }
 0x92a   :  { %2259 = vpow2.f32 %v1603_v33 }
 0x932   :  { %v1600_v34 = vpop.xlane.xlu1 %1599 }
 0x933   :  { %v1602_v35 = vsub.f32 %v1594_v29, %v1600_v34 }
 0x934   :  { %v2260_v36 = vpop.eup %2259 }
 0x935   :  { %v1605_v37 = vmul.f32 1.442695, %v1602_v35  ;;  %v1607_v38 = vsel %vm424_vm2, %v2260_v36, 0.0 }
 0x936   :  { %1608 = vadd.xlane.f32.xlu0 %v1607_v38  ;;  %v1694_v59 = vpop.permute.xlu1 %1693 }
 0x937   :  { %2261 = vpow2.f32 %v1605_v37  ;;  %2170 = vmatpush3.msra.mxu1 %v1694_v59 }
 0x93a   :  { %v1086_v39 = vpop.permute.xlu1 %1085 }
 0x93b   :  { %1092 = vst.msk [vmem:[#allocation2] sm:$0xff] %vm1091_vm3, %v1086_v39 }
 0x93e   :  { %v1088_v40 = vpop.permute.xlu1 %1087 }
 0x93f   :  { %1093 = vst.msk [vmem:[#allocation2 + $0x8] sm:$0xff] %vm1091_vm3, %v1088_v40 }
 0x941   :  { %v2262_v41 = vpop.eup %2261 }
 0x942   :  { %v1431_v42 = vpop.permute.xlu1 %1430  ;;  %v1610_v43 = vsel %vm424_vm2, %v2262_v41, 0.0 }
 0x943   :  { %1436 = vst.msk [vmem:[#allocation2 + $0x8] sm:$0xff] %vm1434_vm4, %v1431_v42  ;;  %1611 = vadd.xlane.f32.xlu0 %v1610_v43 }
 0x959   :  { %1617 = vrot.lane.b32.xlu0 %v2762_v60, %s2494_s6  ;;  %v1790_v60 = vld [vmem:[%s2947_s9] sm:$0xff] }
 0x95a   :  { %v2209_v53 = vpack.c.bf16 %v1791_v52, %v1790_v60 }
 0x95d   :  { %1428 = vrot.lane.b32.xlu0 %v1346_v14, %s2495_s22 }
 0x9c3   :  { %v1609_v44 = vpop.xlane.xlu0 %1608 }
 0x9c4   :  { %2263 = vrcp.f32 %v1609_v44 }
 0x9ce   :  { %v2264_v45 = vpop.eup %2263 }
 0x9cf   :  { %v1614_v46 = vmul.f32 %v2264_v45, %v2260_v36 }
 0x9d0   :  { %v1612_v47 = vpop.xlane.xlu0 %1611 }
 0x9d1   :  { %1783 = vst.msk [vmem:[#allocation16 + $0x18] sm:$0xff] %vm424_vm2, %v1614_v46  ;;  %2265 = vrcp.f32 %v1612_v47 }
 0x9d4   :  { %v1618_v48 = vpop.permute.xlu0 %1617 }
 0x9d5   :  { %2165 = vmatpush3.msra.mxu0 %v1618_v48 }
 0x9d6   :  { %2167 = vmatmul.mubr.msk.f32.vlgmr.msra.gmra.mrb[14].mxu0 %vm424_vm2, %v1614_v46  ;;  %2210 = vmatprep.subr.bf16.mxu0 %v2209_v53 }
 0x9d7   :  { %2212 = vmatpush3.bf16.msra.mxu0 %v2209_v53 }
 0x9d8   :  { %v1429_v49 = vpop.permute.xlu0 %1428  ;;  %2214 = vmatprep.subr.bf16.mxu0 %v2213_v56 }
 0x9d9   :  { %1435 = vst.msk [vmem:[#allocation2] sm:$0xff] %vm1434_vm4, %v1429_v49 }
 0x9db   :  { %v2266_v50 = vpop.eup %2265  ;;  %2216 = vmatpush3.bf16.msra.mxu0 %v2213_v56 }
 0x9dc   :  { %v1616_v51 = vmul.f32 %v2266_v50, %v2262_v41 }
 0x9de   :  { %1787 = vst.msk [vmem:[#allocation16 + $0x38] sm:$0xff] %vm424_vm2, %v1616_v51  ;;  %2172 = vmatmul.mubr.msk.f32.vlgmr.msra.gmra.mrb[20].mxu1 %vm424_vm2, %v1616_v51 }
 0xaa9   :  { %v1689_v57 = vpop.f32.mrb[14].mxu0 }
 0xaaa   :  { %1771 = vrot.lane.b32.xlu0 %v1689_v57, %s2496_s28  ;;  %v2168_v58 = vpop.f32.mrb[15].mxu0 }
 0xab1   :  { %v1765_v61 = vpop.f32.mrb[20].mxu1 }
 0xab2   :  { %1773 = vrot.lane.b32.xlu1 %v1765_v61, %s2496_s28  ;;  %v2173_v62 = vpop.f32.mrb[21].mxu1 }
 0xb1c   :  { %v1772_v63 = vpop.permute.xlu0 %1771 }
 0xb1d   :  { %1778 = vst.msk [vmem:[#allocation2] sm:$0xff] %vm1777_vm5, %v1772_v63 }
 0xb24   :  { %v1774_v0 = vpop.permute.xlu1 %1773  ;;  %v1788_v1 = vld [vmem:[#allocation2] sm:$0xff] }
 0xb25   :  { %1779 = vst.msk [vmem:[#allocation2 + $0x8] sm:$0xff] %vm1777_vm5, %v1774_v0  ;;  %2182 = vmatprep.mubr.msk.f32.mxu0 %vm158_vm0, %v1788_v1 }
 0xb2c   :  { %v1789_v20 = vld [vmem:[#allocation2 + $0x8] sm:$0xff] }
 0xb2d   :  { %2183 = vmatmul.mubr.msk.f32.vlgmr.msra.gmra.mrb[16].mxu0 %vm158_vm0, %v1789_v20 }
 0xc00   :  { %v2184_v26 = vpop.f32.mrb[16].mxu0 }
 0xc01   :  { %v1879_v2 = vadd.f32 %v2184_v26, %v2000_v23  ;;  %v1873_v3 = vpop.f32.mrb[17].mxu0 }
 0xc02   :  { %v1874_v4 = vadd.f32 %v2000_v23, %v1873_v3 }
 0xc03   :  { %v1883_v5 = vadd.f32 %v1879_v2, %v2702_v15 }
 0xc04   :  { %v1882_v6 = vadd.f32 %v1874_v4, %v2698_v13 }
 0xc05   :  { %v1887_v7 = vsel %vm158_vm0, %v1883_v5, 0.0 }
 0xc06   :  { %1888 = vadd.xlane.f32.xlu1 %v1887_v7  ;;  %v1884_v25 = vsel %vm158_vm0, %v1882_v6, 0.0 }
 0xc07   :  { %1885 = vadd.xlane.f32.xlu0 %v1884_v25 }
 0xc93   :  { %v1889_v8 = vpop.xlane.xlu1 %1888 }
 0xc94   :  { %v1892_v9 = vmul.f32 0.03125, %v1889_v8  ;;  %v1886_v10 = vpop.xlane.xlu0 %1885 }
 0xc95   :  { %v1891_v11 = vmul.f32 0.03125, %v1886_v10 }
 0xc96   :  { %v1894_v12 = vsub.f32 %v1883_v5, %v1892_v9 }
 0xc97   :  { %v1893_v14 = vsub.f32 %v1882_v6, %v1891_v11 }
 0xc98   :  { %v1896_v19 = vmul.f32 %v1894_v12, %v1894_v12 }
 0xc99   :  { %v1895_v17 = vmul.f32 %v1893_v14, %v1893_v14 }
 0xc9a   :  { %v1900_v15 = vsel %vm158_vm0, %v1896_v19, 0.0 }
 0xc9b   :  { %v1897_v18 = vsel %vm158_vm0, %v1895_v17, 0.0 }
 0xc9c   :  { %1898 = vadd.xlane.f32.xlu0 %v1897_v18 }
 0xca0   :  { %1901 = vadd.xlane.f32.xlu0 %v1900_v15 }
 0xca1   :  { %2436 = shalt.err (!%p2433_p4)
}
 0xca2   :  { %s2437_s7 = scalar_lea.hbm %s2952_s14, 1024 }
 0xca3   :  { %p2438_p5 = scmp.ne.s32.totalorder %s2952_s14, %s2437_s7  ;;  %p2441_p6 = scmp.lt.u32.totalorder %s2437_s7, %s2952_s14 }
 0xca5   :  { %p2443_p7 = pnand %p2441_p6, %p2438_p5 }
 0xca7   :  { %2446 = shalt.err (!%p2443_p7)
}
 0xca8   :  { %1954 = dma.vmem_to_hbm [thread:$0]  %s1949_s17, 1024, %s2952_s14, [#allocation17], %s2483_s25, %s2483_s25, %s2484_s26  }
 0xca9   :  { %v2003_v30 = vld [vmem:[%s2949_s11] ss:$0 sm:$0xff]  ;;  %s2498_s14 = smov [#allocation15]  }
 0xcaa   :  { %v2004_v16 = vld [vmem:[%s2950_s12] ss:$0 sm:$0xff]  ;;  %s1936_s1 = sshll.u32 %s2498_s14, 4  ;;  %s1937_s1 = int_to_ptr.vmem [resolvable:$true] %s1936_s1 }
 0xcab   :  { %s2447_s30 = scalar_lea.vmem %s1937_s1, 256  ;;  %p2452_p9 = scmp.lt.s32.totalorder %s1937_s1, %s1937_s1 }
 0xcac   :  { %p2448_p8 = scmp.ne.s32.totalorder %s1937_s1, %s2447_s30  ;;  %p2453_p10 = scmp.lt.s32.totalorder %s2447_s30, %s2447_s30 }
 0xcae   :  { %p2454_p11 = por %p2453_p10, %p2452_p9 }
 0xcb0   :  { %p2455_p12 = pnand %p2454_p11, %p2448_p8 }
 0xd29   :  { %v1899_v13 = vpop.xlane.xlu0 %1898 }
 0xd2a   :  { %v1903_v21 = vmul.f32 0.03125, %v1899_v13 }
 0xd2c   :  { %v1905_v22 = vadd.f32 1e-05, %v1903_v21 }
 0xd2d   :  { %v1902_v24 = vpop.xlane.xlu0 %1901 }
 0xd2e   :  { %2267 = vrsqrt.f32 %v1905_v22  ;;  %v1904_v27 = vmul.f32 0.03125, %v1902_v24 }
 0xd30   :  { %v1906_v28 = vadd.f32 1e-05, %v1904_v27 }
 0xd32   :  { %2269 = vrsqrt.f32 %v1906_v28 }
 0xd38   :  { %v2268_v29 = vpop.eup %2267 }
 0xd39   :  { %v1909_v31 = vmul.f32 %v2268_v29, %v1893_v14 }
 0xd3b   :  { %v1918_v32 = vmul.f32 %v2003_v30, %v1909_v31 }
 0xd3c   :  { %v2270_v33 = vpop.eup %2269 }
 0xd3d   :  { %v1910_v34 = vmul.f32 %v2270_v33, %v1894_v12  ;;  %v1927_v35 = vadd.f32 %v2004_v16, %v1918_v32 }
 0xd3f   :  { %v1919_v36 = vmul.f32 %v2003_v30, %v1910_v34  ;;  %1929 = vst.msk [vmem:[#allocation15] sm:$0xff] %vm158_vm0, %v1927_v35 }
 0xd41   :  { %v1928_v37 = vadd.f32 %v2004_v16, %v1919_v36 }
 0xd43   :  { %1930 = vst.msk [vmem:[#allocation15 + $0x8] sm:$0xff] %vm158_vm0, %v1928_v37 }
 0xd44   :  { %2458 = shalt.err (!%p2455_p12)
}
 0xd45   :  { %s2459_s23 = scalar_lea.hbm %s2951_s13, 256 }
 0xd46   :  { %p2460_p13 = scmp.ne.s32.totalorder %s2951_s13, %s2459_s23  ;;  %p2463_p0 = scmp.lt.u32.totalorder %s2459_s23, %s2951_s13 }
 0xd48   :  { %p2465_p1 = pnand %p2463_p0, %p2460_p13 }
 0xd4a   :  { %2468 = shalt.err (!%p2465_p1)
}
 0xd4b   :  { %1942 = dma.vmem_to_hbm [thread:$0]  %s1937_s1, 256, %s2951_s13, [#allocation5], %s2483_s25, %s2483_s25, %s2484_s26  }
 0xd4c   :  { %2477 = dma.done.wait [#allocation5], 256  }
 0xd4d   :  { %2478 = vsyncadd [#allocation5], 4294967040 }
 0xd4e   :  { %2479 = dma.done.wait [#allocation17], 1024  }
 0xd4f   :  { %2480 = vsyncadd [#allocation17], 4294966272 }
 0xd50   :  { %1961 = vsyncpa [#allocation4], 1 }
 0xd51   :  { %1962 = vsyncpa [#allocation7], 1 }
 0xd52   :  { %1963 = vsyncpa [#allocation10], 1 }
 0xd53   :  { %1964 = vsyncpa [#allocation13], 1 }
 0xd54   :  { %1965 = vsyncpa [#allocation5], 1 }
 0xd55   :  { %1966 = vsyncpa [#allocation17], 1 }

</bundles_post_ra>
